<compile_context>
chip_gen: v5e
topology: v5e:2x2
jax: 0.10.0
libtpu: 0.0.40
codegen_flags: <defaults>
</compile_context>

<pallas_src>
import jax
import jax.numpy as jnp
from jax.experimental import pallas as pl
from jax.experimental.pallas import tpu as pltpu


def _round_up(x, m):
    return (x + m - 1) // m * m


def _patch_embed_kernel(p_ref, w_ref, b_ref, o_ref):
    """o = P @ W + b for one (tm, tn) output tile; full-K single-shot reduction."""
    acc = jnp.dot(p_ref[...], w_ref[...], preferred_element_type=jnp.float32)
    o_ref[...] = (acc + b_ref[...]).astype(o_ref.dtype)


def patch_embed_matmul(patches, w_flat, bias_row, *, out_dtype=None, tm=512, tn=1024):
    """patches: (M, K), w_flat: (K, Ep), bias_row: (1, Ep) -> (M, Ep).

    Ep must be a multiple of 128 (lane-dense output). K is consumed whole per step,
    so partial M/E tiles are safe (output stores are masked; W columns zero-padded).
    """
    M, K = patches.shape
    K2, Ep = w_flat.shape
    assert K == K2
    assert Ep % 128 == 0, "pad the embedding dim to a multiple of 128 before calling"
    out_dtype = out_dtype if out_dtype is not None else patches.dtype

    # M tile: full M if small, else a multiple of 8 (MXU-friendly, big to amortize
    # per-step overhead). E tile: multiple of 128 (Ep is), capped for VMEM safety.
    tm = M if M <= tm else _round_up(min(tm, M), 8)
    tn = min(tn, Ep)
    grid = (pl.cdiv(M, tm), pl.cdiv(Ep, tn))

    cost = pl.CostEstimate(
        flops=2 * M * K * Ep,
        transcendentals=0,
        bytes_accessed=(
            M * K * patches.dtype.itemsize
            + K * Ep * w_flat.dtype.itemsize
            + Ep * bias_row.dtype.itemsize
            + M * Ep * jnp.dtype(out_dtype).itemsize
        ),
    )

    return pl.pallas_call(
        _patch_embed_kernel,
        out_shape=jax.ShapeDtypeStruct((M, Ep), out_dtype),
        grid_spec=pltpu.PrefetchScalarGridSpec(
            num_scalar_prefetch=0,
            grid=grid,
            in_specs=[
                pl.BlockSpec((tm, K), lambda i, j: (i, 0)),   # P tile, full K
                pl.BlockSpec((K, tn), lambda i, j: (0, j)),   # W tile, full K
                pl.BlockSpec((1, tn), lambda i, j: (0, j)),   # bias (broadcast over M)
            ],
            out_specs=pl.BlockSpec((tm, tn), lambda i, j: (i, j)),
        ),
        compiler_params=pltpu.CompilerParams(
            # Both axes independent -> megacore sharding (2 TCs on v7x).
            dimension_semantics=("parallel", "parallel"),
            # Default scoped-VMEM limit is plenty for tm<=512 / tn<=1024; raise
            # vmem_limit_bytes only if pushing tiles much larger with big K.
        ),
        cost_estimate=cost,
    )(patches, w_flat, bias_row)


def patch_embedding_forward(x, weight, bias, patch_size, *, compute_dtype=None, tm=512):
    """2-D PatchEmbedding forward.

    Args:
      x:      (B, C, H, W)  -- NCHW, same as the PyTorch module.
      weight: (E, C, p, p)  -- Conv2d weight.
      bias:   (E,)          -- Conv2d bias.
      patch_size: int p (H % p == 0, W % p == 0).
      compute_dtype: e.g. jnp.bfloat16 on v6e/v7x for MXU throughput (f32 accumulate).

    Returns:
      (B, num_patches, E) with num_patches = (H//p) * (W//p).
    """
    B, C, H, W = x.shape
    E = weight.shape[0]
    p = patch_size
    Hp, Wp = H // p, W // p
    K = C * p * p
    M = B * Hp * Wp

    # TODO(synk): patch extraction below is a separate XLA transpose costing roughly
    # one extra HBM round-trip of x; fusing it into the kernel (grid over (b, hp),
    # (c, ph, pw) rearrange in VMEM) would remove it but relies on in-kernel
    # multi-axis transposes that do not always lower cleanly in Mosaic.
    # (B, C, Hp, p, Wp, p) -> (B, Hp, Wp, C, p, p) -> (M, K); inner (c, ph, pw)
    # ordering matches the flattened conv weight.
    patches = x.reshape(B, C, Hp, p, Wp, p).transpose(0, 2, 4, 1, 3, 5)
    patches = patches.reshape(M, K)

    w_flat = weight.reshape(E, K).T                      # (K, E)
    b_row = bias.reshape(1, E).astype(jnp.float32)       # bias added in f32 epilogue

    # Lane-dense output: pad embedding dim up to a multiple of 128 (zeros), slice after.
    Ep = _round_up(E, 128)
    if Ep != E:
        w_flat = jnp.pad(w_flat, ((0, 0), (0, Ep - E)))
        b_row = jnp.pad(b_row, ((0, 0), (0, Ep - E)))

    if compute_dtype is not None:
        patches = patches.astype(compute_dtype)
        w_flat = w_flat.astype(compute_dtype)

    out = patch_embed_matmul(patches, w_flat, b_row, out_dtype=x.dtype, tm=tm)
    out = out[:, :E]
    return out.reshape(B, Hp * Wp, E)


if __name__ == "__main__":
    # Small shapes consistent with the module: B=2, C=4, H=W=16, patch=8, E=32.
    B, C, H, W = 2, 4, 16, 16
    p = 8
    E = 32

    key = jax.random.PRNGKey(0)
    kx, kw, kb = jax.random.split(key, 3)
    x = jax.random.normal(kx, (B, C, H, W), dtype=jnp.float32)
    # Deterministic synthetic Conv2d parameters (same shapes as the PyTorch module).
    weight = jax.random.normal(kw, (E, C, p, p), dtype=jnp.float32) * 0.02
    bias = jax.random.normal(kb, (E,), dtype=jnp.float32) * 0.02

    out = patch_embedding_forward(x, weight, bias, p)
    out = jax.block_until_ready(out)

    # Reference check in plain JAX (same patch-matmul semantics as the conv).
    Hp, Wp = H // p, W // p
    ref_patches = x.reshape(B, C, Hp, p, Wp, p).transpose(0, 2, 4, 1, 3, 5)
    ref_patches = ref_patches.reshape(B * Hp * Wp, C * p * p)
    ref = ref_patches @ weight.reshape(E, -1).T + bias
    ref = ref.reshape(B, Hp * Wp, E)
    assert out.shape == (B, Hp * Wp, E)
    assert jnp.allclose(out, ref, atol=1e-4, rtol=1e-4)

    print("KERNEL_OK")
</pallas_src>

<mosaic_0001>
module attributes {stable_mosaic.version = 11 : i64} {
  func.func @_patch_embed_kernel(%arg0: i32, %arg1: i32, %arg2: memref<8x256xf32, #tpu.memory_space<vmem>>, %arg3: memref<256x128xf32, #tpu.memory_space<vmem>>, %arg4: memref<1x128xf32, #tpu.memory_space<vmem>>, %arg5: memref<8x128xf32, #tpu.memory_space<vmem>>) attributes {dimension_semantics = [#tpu.dimension_semantics<parallel>, #tpu.dimension_semantics<parallel>], iteration_bounds = array<i64: 1, 1>, scalar_prefetch = 0 : i64, scratch_operands = 0 : i64, tpu.core_type = #tpu.core_type<tc>, window_params = [{transform_indices = @transform_0, window_bounds = array<i64: 8, 256>}, {transform_indices = @transform_1, window_bounds = array<i64: 256, 128>}, {transform_indices = @transform_2, window_bounds = array<i64: 1, 128>}, {transform_indices = @transform_3, window_bounds = array<i64: 8, 128>}]} {
    %c0 = arith.constant 0 : index
    %c0_0 = arith.constant 0 : index
    %0 = vector.load %arg2[%c0, %c0_0] : memref<8x256xf32, #tpu.memory_space<vmem>>, vector<8x256xf32>
    %c0_1 = arith.constant 0 : index
    %c0_2 = arith.constant 0 : index
    %1 = vector.load %arg3[%c0_1, %c0_2] : memref<256x128xf32, #tpu.memory_space<vmem>>, vector<256x128xf32>
    %cst = arith.constant dense<0.000000e+00> : vector<8x128xf32>
    %2 = tpu.matmul %0, %1, %cst {dimension_numbers = #tpu.dot_dimension_numbers<[1], [0], [0], [1], [0, 0, 1, 1], [], []>} : vector<8x256xf32>, vector<256x128xf32>, vector<8x128xf32> -> vector<8x128xf32>
    %c0_3 = arith.constant 0 : index
    %c0_4 = arith.constant 0 : index
    %3 = vector.load %arg4[%c0_3, %c0_4] : memref<1x128xf32, #tpu.memory_space<vmem>>, vector<1x128xf32>
    %4 = vector.broadcast %3 : vector<1x128xf32> to vector<8x128xf32>
    %5 = arith.addf %2, %4 : vector<8x128xf32>
    %c0_5 = arith.constant 0 : index
    %c0_6 = arith.constant 0 : index
    %6 = vector.load %arg5[%c0_5, %c0_6] : memref<8x128xf32, #tpu.memory_space<vmem>>, vector<8x128xf32>
    tpu.vector_store %arg5[%c0_5, %c0_6], %5 {strides = array<i32>} : memref<8x128xf32, #tpu.memory_space<vmem>>, vector<8x128xf32>,
    return
  }
  func.func @transform_0(%arg0: i32, %arg1: i32) -> (i32, i32) {
    %c0_i32 = arith.constant 0 : i32
    %c0_i32_0 = arith.constant 0 : i32
    return %arg0, %c0_i32 : i32, i32
  }
  func.func @transform_1(%arg0: i32, %arg1: i32) -> (i32, i32) {
    %c0_i32 = arith.constant 0 : i32
    %c0_i32_0 = arith.constant 0 : i32
    return %c0_i32, %arg1 : i32, i32
  }
  func.func @transform_2(%arg0: i32, %arg1: i32) -> (i32, i32) {
    %c0_i32 = arith.constant 0 : i32
    %c0_i32_0 = arith.constant 0 : i32
    return %c0_i32, %arg1 : i32, i32
  }
  func.func @transform_3(%arg0: i32, %arg1: i32) -> (i32, i32) {
    %c0_i32 = arith.constant 0 : i32
    return %arg0, %arg1 : i32, i32
  }
}

</mosaic_0001>

<bundles_post_ra>
// kernel: tpu_custom_call.1
= control target key start
LH: loop header
LB: loop body
LE: loop exit
PB: predicated region body
PF: predicated region fallthrough
CT: control target
= control target key end

     0   :  { %8 = vsyncpa [#allocation3], 0  ;;  %s263_s0 = inlined_call_operand.hbm [shape: f32[8,256], index: 0, kind: input, shape index: {}]   ;;  %s264_s1 = inlined_call_operand.hbm [shape: f32[256,128], index: 1, kind: input, shape index: {}]   ;;  %s265_s2 = inlined_call_operand.vmem [shape: f32[1,128], index: 2, kind: input, shape index: {}]   ;;  %s266_s3 = inlined_call_operand.hbm [shape: f32[8,128], index: 3, kind: output, shape index: {}]  }
   0x1   :  { %9 = vsyncpa [#allocation6], 0 }
   0x2   :  { %10 = vsyncpa [#allocation4], 0  ;;  %s16_s14 = sshll.u32 %s263_s0, 4  ;;  %s226_s15 = smov [#allocation2]   ;;  %s17_s14 = int_to_ptr.hbm [resolvable:$true] %s16_s14 }
   0x3   :  { %s18_s16 = sshll.u32 %s226_s15, 4  ;;  %s26_s19 = sshll.u32 %s264_s1, 4  ;;  %s19_s16 = int_to_ptr.vmem [resolvable:$true] %s18_s16  ;;  %s27_s19 = int_to_ptr.hbm [resolvable:$true] %s26_s19 }
   0x4   :  { %21 = dma.hbm_to_vmem [thread:$0]  %s17_s14, 256, %s19_s16, [#allocation3]  }
   0x5   :  { %s227_s20 = smov [#allocation5]   ;;  %s228_s22 = smov 128  }
   0x6   :  { %s28_s21 = sshll.u32 %s227_s20, 4  ;;  %s229_s23 = smov 8   ;;  %s29_s21 = int_to_ptr.vmem [resolvable:$true] %s28_s21 }
   0x7   :  { %34 = dma.hbm_to_vmem [thread:$0]  %s27_s19, 4096, %s29_s21, [#allocation6], %s228_s22, %s228_s22, %s229_s23  }
   0x8   :  { %220 = dma.done.wait [#allocation3], 256  }
   0x9   :  { %221 = vsyncadd [#allocation3], 4294967040 }
   0xa   :  { %222 = dma.done.wait [#allocation6], 4096  }
   0xb   :  { %223 = vsyncadd [#allocation6], 4294963200  ;;  %v62_v0 = vld [vmem:[#allocation5 + $0x78] sm:$0xff]  ;;  %v61_v1 = vld [vmem:[#allocation5 + $0x70] sm:$0xff]  ;;  %s230_s24 = smov [#allocation7]   ;;  %s131_s28 = sshll.u32 %s266_s3, 4  ;;  %s132_s28 = int_to_ptr.hbm [resolvable:$true] %s131_s28 }
   0xc   :  { %v78_v2 = vld [vmem:[#allocation5 + $0xf8] sm:$0xff]  ;;  %83 = vmatpush.msra.mxu0 %v62_v0  ;;  %v77_v3 = vld [vmem:[#allocation5 + $0xf0] sm:$0xff]  ;;  %v60_v4 = vld [vmem:[#allocation5 + $0x68] sm:$0xff]  ;;  %s129_s25 = sshll.u32 %s230_s24, 4  ;;  %s130_s25 = int_to_ptr.vmem [resolvable:$true] %s129_s25 }
   0xd   :  { %103 = vmatpush.msra.mxu1 %v78_v2  ;;  %v76_v5 = vld [vmem:[#allocation5 + $0xe8] sm:$0xff]  ;;  %v59_v6 = vld [vmem:[#allocation5 + $0x60] sm:$0xff]  ;;  %v58_v8 = vld [vmem:[#allocation5 + $0x58] sm:$0xff] }
   0xe   :  { %84 = vmatpush.msra.mxu0 %v61_v1  ;;  %v75_v7 = vld [vmem:[#allocation5 + $0xe0] sm:$0xff]  ;;  %v74_v9 = vld [vmem:[#allocation5 + $0xd8] sm:$0xff]  ;;  %v57_v10 = vld [vmem:[#allocation5 + $0x50] sm:$0xff] }
   0xf   :  { %104 = vmatpush.msra.mxu1 %v77_v3  ;;  %v73_v11 = vld [vmem:[#allocation5 + $0xd0] sm:$0xff]  ;;  %v56_v12 = vld [vmem:[#allocation5 + $0x48] sm:$0xff]  ;;  %v55_v14 = vld [vmem:[#allocation5 + $0x40] sm:$0xff] }
  0x10   :  { %85 = vmatpush.msra.mxu0 %v60_v4  ;;  %v72_v13 = vld [vmem:[#allocation5 + $0xc8] sm:$0xff]  ;;  %v71_v15 = vld [vmem:[#allocation5 + $0xc0] sm:$0xff]  ;;  %v54_v16 = vld [vmem:[#allocation5 + $0x38] sm:$0xff] }
  0x11   :  { %105 = vmatpush.msra.mxu1 %v76_v5  ;;  %v70_v17 = vld [vmem:[#allocation5 + $0xb8] sm:$0xff]  ;;  %v53_v18 = vld [vmem:[#allocation5 + $0x30] sm:$0xff]  ;;  %v52_v20 = vld [vmem:[#allocation5 + $0x28] sm:$0xff] }
  0x12   :  { %86 = vmatpush.msra.mxu0 %v59_v6  ;;  %v69_v19 = vld [vmem:[#allocation5 + $0xb0] sm:$0xff]  ;;  %v68_v21 = vld [vmem:[#allocation5 + $0xa8] sm:$0xff]  ;;  %v51_v22 = vld [vmem:[#allocation5 + $0x20] sm:$0xff] }
  0x13   :  { %106 = vmatpush.msra.mxu1 %v75_v7  ;;  %v67_v23 = vld [vmem:[#allocation5 + $0xa0] sm:$0xff]  ;;  %v50_v24 = vld [vmem:[#allocation5 + $0x18] sm:$0xff]  ;;  %v49_v26 = vld [vmem:[#allocation5 + $0x10] sm:$0xff] }
  0x14   :  { %87 = vmatpush.msra.mxu0 %v58_v8  ;;  %v66_v25 = vld [vmem:[#allocation5 + $0x98] sm:$0xff]  ;;  %v65_v27 = vld [vmem:[#allocation5 + $0x90] sm:$0xff]  ;;  %v48_v28 = vld [vmem:[#allocation5 + $0x8] sm:$0xff] }
  0x15   :  { %107 = vmatpush.msra.mxu1 %v74_v9  ;;  %v64_v29 = vld [vmem:[#allocation5 + $0x88] sm:$0xff]  ;;  %v47_v30 = vld [vmem:[#allocation5] sm:$0xff]  ;;  %v45_v32 = vld [vmem:[#allocation2] sm:$0xff] }
  0x16   :  { %88 = vmatpush.msra.mxu0 %v57_v10  ;;  %v63_v31 = vld [vmem:[#allocation5 + $0x80] sm:$0xff]  ;;  %v46_v33 = vld [vmem:[#allocation2 + $0x8] sm:$0xff]  ;;  %v147_v34 = vld [vmem:[%s265_s2] ss:$0 sm:$0xff] }
  0x17   :  { %108 = vmatpush.msra.mxu1 %v73_v11 }
  0x18   :  { %89 = vmatpush.msra.mxu0 %v56_v12 }
  0x19   :  { %109 = vmatpush.msra.mxu1 %v72_v13 }
  0x1a   :  { %90 = vmatpush.msra.mxu0 %v55_v14 }
  0x1b   :  { %110 = vmatpush.msra.mxu1 %v71_v15 }
  0x1c   :  { %91 = vmatpush.msra.mxu0 %v54_v16 }
  0x1d   :  { %111 = vmatpush.msra.mxu1 %v70_v17 }
  0x1e   :  { %92 = vmatpush.msra.mxu0 %v53_v18 }
  0x1f   :  { %112 = vmatpush.msra.mxu1 %v69_v19 }
  0x20   :  { %93 = vmatpush.msra.mxu0 %v52_v20 }
  0x21   :  { %113 = vmatpush.msra.mxu1 %v68_v21 }
  0x22   :  { %94 = vmatpush.msra.mxu0 %v51_v22 }
  0x23   :  { %114 = vmatpush.msra.mxu1 %v67_v23 }
  0x24   :  { %95 = vmatpush.msra.mxu0 %v50_v24 }
  0x25   :  { %115 = vmatpush.msra.mxu1 %v66_v25 }
  0x26   :  { %96 = vmatpush.msra.mxu0 %v49_v26 }
  0x27   :  { %116 = vmatpush.msra.mxu1 %v65_v27 }
  0x28   :  { %97 = vmatpush.msra.mxu0 %v48_v28 }
  0x29   :  { %117 = vmatpush.msra.mxu1 %v64_v29 }
  0x2a   :  { %98 = vmatpush.msra.mxu0 %v47_v30 }
  0x2b   :  { %118 = vmatpush.msra.mxu1 %v63_v31  ;;  %99 = vmatmul.f32.vlgmr.msra.gmra.mxu0 %v45_v32 }
  0x2c   :  { %119 = vmatmul.f32.vlgmr.msra.gmra.mxu1 %v46_v33 }
  0xa8   :  { %v100_v35 = vpop.f32.mrf.mxu0 }
  0xa9   :  { %v120_v36 = vpop.f32.mrf.mxu1  ;;  %v101_v37 = vadd.f32 %v147_v34, %v100_v35 }
  0xab   :  { %v121_v38 = vadd.f32 %v120_v36, %v101_v37 }
  0xad   :  { %123 = vst [vmem:[#allocation7] sm:$0xff] %v121_v38 }
  0xae   :  { %134 = dma.vmem_to_hbm [thread:$0]  %s130_s25, 128, %s132_s28, [#allocation4]  }
  0xaf   :  { %224 = dma.done.wait [#allocation4], 128  }
  0xb0   :  { %225 = vsyncadd [#allocation4], 4294967168 }
  0xb1   :  { %139 = vsyncpa [#allocation3], 1 }
  0xb2   :  { %140 = vsyncpa [#allocation6], 1 }
  0xb3   :  { %141 = vsyncpa [#allocation4], 1 }

</bundles_post_ra>
